<compile_context>
chip_gen: v6e
topology: v6e:2x2x1
jax: 0.10.0
libtpu: 0.0.40
codegen_flags: <defaults>
</compile_context>

<pallas_src>
import jax
import jax.numpy as jnp
from jax.experimental import pallas as pl
from jax.experimental.pallas import tpu as pltpu


def _round_up(x, m):
    return (x + m - 1) // m * m


def _fit_tile(tile, dim, granule):
    """Clamp a (granule-multiple) tile to an array dim.

    If the dim is smaller than the tile, use the full dim itself (a block equal
    to the full array dim is always legal, even when unaligned); otherwise keep
    the granule-multiple tile and let the trailing block be partial.
    """
    del granule
    return dim if dim < tile else tile


# --------------------------------------------------------------------------- #
# Kernels
# --------------------------------------------------------------------------- #

def _linear_relu_kernel_f32(x_ref, w_ref, b_ref, o_ref):
    """f32 output: accumulate directly into the k-resident output tile."""
    @pl.when(pl.program_id(2) == 0)
    def _():
        o_ref[...] = jnp.zeros_like(o_ref)

    o_ref[...] += jnp.dot(x_ref[...], w_ref[...],
                          preferred_element_type=jnp.float32)

    @pl.when(pl.program_id(2) == pl.num_programs(2) - 1)
    def _():
        o_ref[...] = jnp.maximum(o_ref[...] + b_ref[...], 0.0)


def _linear_relu_kernel_acc(x_ref, w_ref, b_ref, o_ref, acc_ref):
    """Non-f32 output: accumulate in an f32 VMEM scratch, cast at the end."""
    @pl.when(pl.program_id(2) == 0)
    def _():
        acc_ref[...] = jnp.zeros_like(acc_ref)

    acc_ref[...] += jnp.dot(x_ref[...], w_ref[...],
                            preferred_element_type=jnp.float32)

    @pl.when(pl.program_id(2) == pl.num_programs(2) - 1)
    def _():
        y = acc_ref[...] + b_ref[...]
        o_ref[...] = jnp.maximum(y, 0.0).astype(o_ref.dtype)


# --------------------------------------------------------------------------- #
# Wrapper with cached (pre-padded / pre-transposed / pre-cast) parameters
# --------------------------------------------------------------------------- #

def _vmem_budget_bytes():
    """(scoped VMEM budget to request, physical VMEM capacity)."""
    try:
        phys = int(pltpu.get_tpu_info().vmem_capacity_bytes)
    except Exception:
        phys = 64 * 1024 * 1024
    if phys <= 64 * 1024 * 1024:          # v7x-class: 64 MiB per TensorCore
        return 48 * 1024 * 1024, phys
    return 64 * 1024 * 1024, phys         # v5e / v6e: 128 MiB physical


def make_generic_processor(weight, bias, *, compute_dtype=None,
                           tile_b=None, tile_n=None, tile_k=None,
                           num_cores=1):
    """Build apply(x) computing relu(x @ weight.T + bias) with cached params.

    weight: [emb_dim, input_dim]   (torch nn.Linear layout)
    bias:   [emb_dim]
    compute_dtype: MXU feed dtype. None -> bf16 when params are f32 (f32 MXU is
        a slow multi-pass emulation); accumulation is always f32.  Pass
        jnp.float32 explicitly for reference-exact numerics.
    num_cores: TensorCores to split a degenerate (1,1,K) grid across (2 on
        v7x); keep 1 on single-TC v5e/v6e - splitting there only re-streams W.
    """
    N, K = int(weight.shape[0]), int(weight.shape[1])
    assert bias.shape == (N,)

    if compute_dtype is None:
        compute_dtype = (jnp.bfloat16 if weight.dtype == jnp.float32
                         else weight.dtype)
    compute_dtype = jnp.dtype(compute_dtype)
    cbytes = compute_dtype.itemsize

    budget, phys = _vmem_budget_bytes()
    big_vmem = phys > 64 * 1024 * 1024

    # Generation-aware defaults: larger on 128-MiB chips (clear the v6e
    # roofline knee), moderate on v7x's 64-MiB VMEM.
    if tile_b is None:
        tile_b = 1024 if big_vmem else 512
    if tile_n is None:
        tile_n = 1536 if big_vmem else 1024
    if tile_k is None:
        tile_k = 1024

    sub = 16 if cbytes < 4 else 8         # bf16 packs 16 rows per sublane pair
    tile_n = _fit_tile(tile_n, N, 128)
    tile_k = min(tile_k, _round_up(K, 128))

    def _footprint(tb, tn, tk):
        inp = 2 * (tb * tk + tk * tn + tn) * cbytes     # double-buffered inputs
        out = 2 * tb * tn * 4                           # double-buffered output
        acc = tb * tn * 4                               # worst case: acc scratch
        return inp + out + acc

    # Shrink until the double-buffered working set fits the scoped budget.
    while _footprint(tile_b, tile_n, tile_k) > budget and (
            tile_k > 128 or tile_n > 128 or tile_b > sub):
        if tile_k >= max(tile_n, tile_b) and tile_k > 128:
            tile_k = max(128, tile_k // 2)
        elif tile_n >= tile_b and tile_n > 128:
            tile_n = max(128, tile_n // 2)
        elif tile_b > sub:
            tile_b = max(sub, _round_up(tile_b // 2, sub))
        else:
            break

    # K must be zero-padded (garbage along K would corrupt valid outputs).
    K_pad = _round_up(K, tile_k)

    # One-time parameter preparation (cached; no per-call HBM traffic).
    wp = weight if K_pad == K else jnp.pad(weight, ((0, 0), (0, K_pad - K)))
    w_t = jnp.asarray(wp.T, dtype=compute_dtype)          # [K_pad, N]
    b2 = jnp.asarray(bias, dtype=jnp.float32).reshape(1, N)

    def apply(x, use_pallas=None):
        B, Kx = x.shape
        assert Kx == K, f"expected input_dim={K}, got {Kx}"
        out_dtype = x.dtype

        if use_pallas is None:
            use_pallas = (B * N * K) >= (1 << 21)
        if not use_pallas:
            y = jnp.dot(x.astype(compute_dtype), w_t[:K, :],
                        preferred_element_type=jnp.float32)
            return jnp.maximum(y + b2, 0.0).astype(out_dtype)

        tb = _fit_tile(tile_b, B, sub)
        tn = tile_n
        # Megacore: only on multi-TC chips, and split N (duplicates the small x
        # stream rather than the big W stream), rounded to 256.
        if (num_cores >= 2 and pl.cdiv(B, tb) < 2 and pl.cdiv(N, tn) < 2
                and N >= 512):
            tn = max(256, _round_up(pl.cdiv(N, num_cores), 256))

        # Only K is padded; B/N trailing blocks are partial (masked on write).
        xp = x if K_pad == K else jnp.pad(x, ((0, 0), (0, K_pad - K)))
        xp = xp.astype(compute_dtype)

        grid = (pl.cdiv(B, tb), pl.cdiv(N, tn), K_pad // tile_k)

        use_acc = (out_dtype != jnp.float32)
        kernel = _linear_relu_kernel_acc if use_acc else _linear_relu_kernel_f32
        scratch = [pltpu.VMEM((tb, tn), jnp.float32)] if use_acc else []

        out = pl.pallas_call(
            kernel,
            out_shape=jax.ShapeDtypeStruct((B, N), out_dtype),
            grid_spec=pltpu.PrefetchScalarGridSpec(
                num_scalar_prefetch=0,
                grid=grid,
                in_specs=[
                    pl.BlockSpec((tb, tile_k), lambda i, j, k: (i, k)),  # x
                    pl.BlockSpec((tile_k, tn), lambda i, j, k: (k, j)),  # W [K,N]
                    pl.BlockSpec((1, tn),      lambda i, j, k: (0, j)),  # bias
                ],
                out_specs=pl.BlockSpec((tb, tn), lambda i, j, k: (i, j)),
                scratch_shapes=scratch,
            ),
            compiler_params=pltpu.CompilerParams(
                dimension_semantics=("parallel", "parallel", "arbitrary"),
                vmem_limit_bytes=budget,
            ),
        )(xp, w_t, b2)
        return out

    return jax.jit(apply, static_argnames=("use_pallas",))


def generic_processor(x, weight, bias, **kwargs):
    """Functional convenience wrapper (params are prepared per call; prefer
    make_generic_processor() when the weight is reused across calls)."""
    use_pallas = kwargs.pop("use_pallas", None)
    return make_generic_processor(weight, bias, **kwargs)(x, use_pallas=use_pallas)


# --------------------------------------------------------------------------- #
# Demo / self-test
# --------------------------------------------------------------------------- #

if __name__ == "__main__":
    key = jax.random.PRNGKey(0)
    kx, kw, kb = jax.random.split(key, 3)

    B, input_dim, emb_dim = 8, 32, 64

    x = jax.random.normal(kx, (B, input_dim), dtype=jnp.float32)
    # nn.Linear-shaped synthetic parameters: W [emb, in], b [emb]
    bound = 1.0 / (input_dim ** 0.5)
    weight = jax.random.uniform(kw, (emb_dim, input_dim),
                                minval=-bound, maxval=bound, dtype=jnp.float32)
    bias = jax.random.uniform(kb, (emb_dim,),
                              minval=-bound, maxval=bound, dtype=jnp.float32)

    y_ref = jnp.maximum(x @ weight.T + bias, 0.0)

    # f32 MXU feed (reference-exact), Pallas path forced at this tiny shape.
    proc_f32 = make_generic_processor(weight, bias, compute_dtype=jnp.float32)
    y_f32 = proc_f32(x, use_pallas=True)
    jax.block_until_ready(y_f32)
    assert y_f32.shape == (B, emb_dim)
    assert jnp.allclose(y_f32, y_ref, atol=1e-5, rtol=1e-5)

    # Default: bf16 MXU feed, f32 accumulate (looser tolerance vs f32 ref).
    proc_bf16 = make_generic_processor(weight, bias)
    y_bf16 = proc_bf16(x, use_pallas=True)
    jax.block_until_ready(y_bf16)
    assert jnp.allclose(y_bf16, y_ref, atol=3e-2, rtol=3e-2)

    # Auto dispatch: this shape is below the threshold -> fused XLA fallback.
    y_auto = proc_f32(x)
    jax.block_until_ready(y_auto)
    assert jnp.allclose(y_auto, y_ref, atol=1e-5, rtol=1e-5)

    print("KERNEL_OK")
</pallas_src>

<mosaic_0001>
module attributes {stable_mosaic.version = 11 : i64} {
  func.func @_linear_relu_kernel_f32(%arg0: i32, %arg1: i32, %arg2: i32, %arg3: memref<8x128xf32, #tpu.memory_space<vmem>>, %arg4: memref<128x64xf32, #tpu.memory_space<vmem>>, %arg5: memref<1x64xf32, #tpu.memory_space<vmem>>, %arg6: memref<8x64xf32, #tpu.memory_space<vmem>>) attributes {dimension_semantics = [#tpu.dimension_semantics<parallel>, #tpu.dimension_semantics<parallel>, #tpu.dimension_semantics<arbitrary>], iteration_bounds = array<i64: 1, 1, 1>, scalar_prefetch = 0 : i64, scratch_operands = 0 : i64, tpu.core_type = #tpu.core_type<tc>, window_params = [{transform_indices = @transform_0, window_bounds = array<i64: 8, 128>}, {transform_indices = @transform_1, window_bounds = array<i64: 128, 64>}, {transform_indices = @transform_2, window_bounds = array<i64: 1, 64>}, {transform_indices = @transform_3, window_bounds = array<i64: 8, 64>}]} {
    %c0_i32 = arith.constant 0 : i32
    %0 = arith.cmpi eq, %arg2, %c0_i32 : i32
    %1 = arith.extui %0 : i1 to i32
    %c0_i32_0 = arith.constant 0 : i32
    %2 = arith.cmpi ne, %1, %c0_i32_0 : i32
    scf.if %2 {
      %cst_10 = arith.constant 0.000000e+00 : f32
      %12 = vector.broadcast %cst_10 : f32 to vector<8x64xf32>
      %c0_11 = arith.constant 0 : index
      %c0_12 = arith.constant 0 : index
      %13 = vector.load %arg6[%c0_11, %c0_12] : memref<8x64xf32, #tpu.memory_space<vmem>>, vector<8x64xf32>
      tpu.vector_store %arg6[%c0_11, %c0_12], %12 {strides = array<i32>} : memref<8x64xf32, #tpu.memory_space<vmem>>, vector<8x64xf32>,
    } else {
    }
    %c0 = arith.constant 0 : index
    %c0_1 = arith.constant 0 : index
    %3 = vector.load %arg6[%c0, %c0_1] : memref<8x64xf32, #tpu.memory_space<vmem>>, vector<8x64xf32>
    %c0_2 = arith.constant 0 : index
    %c0_3 = arith.constant 0 : index
    %4 = vector.load %arg3[%c0_2, %c0_3] : memref<8x128xf32, #tpu.memory_space<vmem>>, vector<8x128xf32>
    %c0_4 = arith.constant 0 : index
    %c0_5 = arith.constant 0 : index
    %5 = vector.load %arg4[%c0_4, %c0_5] : memref<128x64xf32, #tpu.memory_space<vmem>>, vector<128x64xf32>
    %cst = arith.constant dense<0.000000e+00> : vector<8x64xf32>
    %6 = tpu.matmul %4, %5, %cst {dimension_numbers = #tpu.dot_dimension_numbers<[1], [0], [0], [1], [0, 0, 1, 1], [], []>} : vector<8x128xf32>, vector<128x64xf32>, vector<8x64xf32> -> vector<8x64xf32>
    %7 = arith.addf %3, %6 : vector<8x64xf32>
    %c0_6 = arith.constant 0 : index
    %c0_7 = arith.constant 0 : index
    %8 = vector.load %arg6[%c0_6, %c0_7] : memref<8x64xf32, #tpu.memory_space<vmem>>, vector<8x64xf32>
    tpu.vector_store %arg6[%c0_6, %c0_7], %7 {strides = array<i32>} : memref<8x64xf32, #tpu.memory_space<vmem>>, vector<8x64xf32>,
    %c0_i32_8 = arith.constant 0 : i32
    %9 = arith.cmpi eq, %arg2, %c0_i32_8 : i32
    %10 = arith.extui %9 : i1 to i32
    %c0_i32_9 = arith.constant 0 : i32
    %11 = arith.cmpi ne, %10, %c0_i32_9 : i32
    scf.if %11 {
      %c0_10 = arith.constant 0 : index
      %c0_11 = arith.constant 0 : index
      %12 = vector.load %arg6[%c0_10, %c0_11] : memref<8x64xf32, #tpu.memory_space<vmem>>, vector<8x64xf32>
      %c0_12 = arith.constant 0 : index
      %c0_13 = arith.constant 0 : index
      %13 = vector.load %arg5[%c0_12, %c0_13] : memref<1x64xf32, #tpu.memory_space<vmem>>, vector<1x64xf32>
      %14 = vector.broadcast %13 : vector<1x64xf32> to vector<8x64xf32>
      %15 = arith.addf %12, %14 : vector<8x64xf32>
      %cst_14 = arith.constant 0.000000e+00 : f32
      %16 = vector.broadcast %cst_14 : f32 to vector<8x64xf32>
      %17 = arith.maximumf %15, %16 : vector<8x64xf32>
      %c0_15 = arith.constant 0 : index
      %c0_16 = arith.constant 0 : index
      %18 = vector.load %arg6[%c0_15, %c0_16] : memref<8x64xf32, #tpu.memory_space<vmem>>, vector<8x64xf32>
      tpu.vector_store %arg6[%c0_15, %c0_16], %17 {strides = array<i32>} : memref<8x64xf32, #tpu.memory_space<vmem>>, vector<8x64xf32>,
    } else {
    }
    return
  }
  func.func @transform_0(%arg0: i32, %arg1: i32, %arg2: i32) -> (i32, i32) {
    %c0_i32 = arith.constant 0 : i32
    return %arg0, %arg2 : i32, i32
  }
  func.func @transform_1(%arg0: i32, %arg1: i32, %arg2: i32) -> (i32, i32) {
    %c0_i32 = arith.constant 0 : i32
    return %arg2, %arg1 : i32, i32
  }
  func.func @transform_2(%arg0: i32, %arg1: i32, %arg2: i32) -> (i32, i32) {
    %c0_i32 = arith.constant 0 : i32
    %c0_i32_0 = arith.constant 0 : i32
    return %c0_i32, %arg1 : i32, i32
  }
  func.func @transform_3(%arg0: i32, %arg1: i32, %arg2: i32) -> (i32, i32) {
    %c0_i32 = arith.constant 0 : i32
    return %arg0, %arg1 : i32, i32
  }
}

</mosaic_0001>

<bundles_post_ra>
// kernel: apply.1
= control target key start
LH: loop header
LB: loop body
LE: loop exit
PB: predicated region body
PF: predicated region fallthrough
CT: control target
= control target key end

     0   :  { %8 = vsyncpa [#allocation3], 0  ;;  %s299_s0 = inlined_call_operand.vmem [shape: f32[8,128], index: 0, kind: input, shape index: {}]   ;;  %s300_s1 = inlined_call_operand.hbm [shape: f32[128,64], index: 1, kind: input, shape index: {}]   ;;  %s301_s2 = inlined_call_operand.vmem [shape: f32[1,64], index: 2, kind: input, shape index: {}]   ;;  %s302_s3 = inlined_call_operand.hbm [shape: f32[8,64], index: 3, kind: output, shape index: {}]  }
   0x1   :  { %9 = vsyncpa [#allocation4], 0  ;;  %s258_s12 = smov [#allocation2]  }
   0x2   :  { %s17_s13 = sshll.u32 %s258_s12, 4  ;;  %s18_s13 = int_to_ptr.vmem [resolvable:$true] %s17_s13 }
   0x3   :  { %s222_s14 = scalar_lea.vmem %s18_s13, 2048  ;;  %p227_p1 = scmp.lt.s32.totalorder %s18_s13, %s18_s13 }
   0x4   :  { %p223_p0 = scmp.ne.s32.totalorder %s18_s13, %s222_s14  ;;  %p228_p2 = scmp.lt.s32.totalorder %s222_s14, %s222_s14 }
   0x6   :  { %p229_p3 = por %p228_p2, %p227_p1 }
   0x8   :  { %p230_p4 = pnand %p229_p3, %p223_p0 }
   0xa   :  { %233 = shalt.err (!%p230_p4)
}
   0xb   :  { %s259_s15 = smov 128   ;;  %s260_s16 = smov 8  }
   0xc   :  { %23 = dma.hbm_to_vmem [thread:$0]  %s300_s1, 2048, %s18_s13, [#allocation3], %s259_s15, %s259_s15, %s260_s16  }
   0xd   :  { %254 = dma.done.wait [#allocation3], 2048  }
   0xe   :  { %255 = vsyncadd [#allocation3], 4294965248  ;;  %vm33_vm0 = vcmask 523264   ;;  %v261_v0 = vmov 0.0   ;;  %vm262_vm1 = vmmov 0   ;;  %v52_v1 = vld [vmem:[#allocation2 + $0x78] sm:$0xff] }
   0xf   :  { %173 = vmatprep.subr.mxu0 %v261_v0  ;;  %205 = vmatprep.mubr.msk.f32.mxu0 %vm262_vm1, %v261_v0  ;;  %34 = vst.msk [vmem:[#allocation5] sm:$0xff] %vm33_vm0, %v261_v0  ;;  %v51_v2 = vld [vmem:[#allocation2 + $0x70] sm:$0xff]  ;;  %v50_v3 = vld [vmem:[#allocation2 + $0x68] sm:$0xff]  ;;  %v49_v4 = vld [vmem:[#allocation2 + $0x60] sm:$0xff]  ;;  %s263_s22 = smov [#allocation5]  }
  0x10   :  { %174 = vmatpush3.msra.mxu0 %v52_v1  ;;  %v48_v5 = vld [vmem:[#allocation2 + $0x58] sm:$0xff]  ;;  %v47_v6 = vld [vmem:[#allocation2 + $0x50] sm:$0xff]  ;;  %v46_v7 = vld [vmem:[#allocation2 + $0x48] sm:$0xff]  ;;  %s146_s23 = sshll.u32 %s263_s22, 4  ;;  %s147_s23 = int_to_ptr.vmem [resolvable:$true] %s146_s23 }
  0x11   :  { %175 = vmatprep.subr.mxu0 %v261_v0  ;;  %v45_v8 = vld [vmem:[#allocation2 + $0x40] sm:$0xff]  ;;  %v44_v9 = vld [vmem:[#allocation2 + $0x38] sm:$0xff]  ;;  %v43_v10 = vld [vmem:[#allocation2 + $0x30] sm:$0xff]  ;;  %p239_p6 = scmp.lt.s32.totalorder %s147_s23, %s147_s23 }
  0x12   :  { %176 = vmatpush3.msra.mxu0 %v51_v2  ;;  %v42_v11 = vld [vmem:[#allocation2 + $0x28] sm:$0xff]  ;;  %v41_v12 = vld [vmem:[#allocation2 + $0x20] sm:$0xff]  ;;  %v40_v13 = vld [vmem:[#allocation2 + $0x18] sm:$0xff] }
  0x13   :  { %177 = vmatprep.subr.mxu0 %v261_v0  ;;  %v39_v14 = vld [vmem:[#allocation2 + $0x10] sm:$0xff]  ;;  %v38_v15 = vld [vmem:[#allocation2 + $0x8] sm:$0xff]  ;;  %v37_v16 = vld [vmem:[#allocation2] sm:$0xff] }
  0x14   :  { %178 = vmatpush3.msra.mxu0 %v50_v3  ;;  %v36_v17 = vld [vmem:[%s299_s0] sm:$0xff]  ;;  %s234_s0 = scalar_lea.vmem %s147_s23, 128 }
  0x15   :  { %179 = vmatprep.subr.mxu0 %v261_v0  ;;  %v155_v22 = vld [vmem:[%s301_s2] ss:$0 sm:$0xff]  ;;  %p235_p5 = scmp.ne.s32.totalorder %s147_s23, %s234_s0  ;;  %p240_p7 = scmp.lt.s32.totalorder %s234_s0, %s234_s0 }
  0x16   :  { %180 = vmatpush3.msra.mxu0 %v49_v4  ;;  %v35_v18 = vld [vmem:[#allocation5] sm:$0xff] }
  0x17   :  { %181 = vmatprep.subr.mxu0 %v261_v0  ;;  %p241_p8 = por %p240_p7, %p239_p6 }
  0x18   :  { %182 = vmatpush3.msra.mxu0 %v48_v5 }
  0x19   :  { %183 = vmatprep.subr.mxu0 %v261_v0  ;;  %p242_p9 = pnand %p241_p8, %p235_p5 }
  0x1a   :  { %184 = vmatpush3.msra.mxu0 %v47_v6 }
  0x1b   :  { %185 = vmatprep.subr.mxu0 %v261_v0 }
  0x1c   :  { %186 = vmatpush3.msra.mxu0 %v46_v7 }
  0x1d   :  { %187 = vmatprep.subr.mxu0 %v261_v0 }
  0x1e   :  { %188 = vmatpush3.msra.mxu0 %v45_v8 }
  0x1f   :  { %189 = vmatprep.subr.mxu0 %v261_v0 }
  0x20   :  { %190 = vmatpush3.msra.mxu0 %v44_v9 }
  0x21   :  { %191 = vmatprep.subr.mxu0 %v261_v0 }
  0x22   :  { %192 = vmatpush3.msra.mxu0 %v43_v10 }
  0x23   :  { %193 = vmatprep.subr.mxu0 %v261_v0 }
  0x24   :  { %194 = vmatpush3.msra.mxu0 %v42_v11 }
  0x25   :  { %195 = vmatprep.subr.mxu0 %v261_v0 }
  0x26   :  { %196 = vmatpush3.msra.mxu0 %v41_v12 }
  0x27   :  { %197 = vmatprep.subr.mxu0 %v261_v0 }
  0x28   :  { %198 = vmatpush3.msra.mxu0 %v40_v13 }
  0x29   :  { %199 = vmatprep.subr.mxu0 %v261_v0 }
  0x2a   :  { %200 = vmatpush3.msra.mxu0 %v39_v14 }
  0x2b   :  { %201 = vmatprep.subr.mxu0 %v261_v0 }
  0x2c   :  { %202 = vmatpush3.msra.mxu0 %v38_v15 }
  0x2d   :  { %203 = vmatprep.subr.mxu0 %v261_v0 }
  0x2e   :  { %204 = vmatpush3.msra.mxu0 %v37_v16 }
  0x2f   :  { %206 = vmatmul.mubr.f32.vlgmr.msra.gmra.mxu0 %v36_v17 }
  0xef   :  { %v119_v19 = vpop.f32.mrf.mxu0 }
  0xf0   :  { %v123_v20 = vadd.f32 %v119_v19, %v35_v18 }
  0xf1   :  { %v207_v21 = vpop.f32.mrf.mxu0 }
  0xf2   :  { %125 = vst.msk [vmem:[#allocation5] sm:$0xff] %vm33_vm0, %v123_v20 }
  0xf9   :  { %v129_v23 = vld [vmem:[#allocation5] sm:$0xff] }
  0xfa   :  { %v137_v24 = vadd.f32 %v155_v22, %v129_v23 }
  0xfc   :  { %v138_v25 = vmax.f32 %v137_v24, 0.0 }
  0xfe   :  { %139 = vst.msk [vmem:[#allocation5] sm:$0xff] %vm33_vm0, %v138_v25 }
  0xff   :  { %245 = shalt.err (!%p242_p9)
}
 0x100   :  { %149 = dma.vmem_to_hbm [thread:$0]  %s147_s23, 128, %s302_s3, [#allocation4]  }
 0x101   :  { %256 = dma.done.wait [#allocation4], 128  }
 0x102   :  { %257 = vsyncadd [#allocation4], 4294967168 }
 0x103   :  { %153 = vsyncpa [#allocation3], 1 }
 0x104   :  { %154 = vsyncpa [#allocation4], 1 }

</bundles_post_ra>
